<compile_context>
chip_gen: v6e
topology: v6e:2x2x1
jax: 0.10.0
libtpu: 0.0.40
codegen_flags: <defaults>
</compile_context>

<pallas_src>
import math

import jax
import jax.numpy as jnp
from jax import lax
from jax.experimental import pallas as pl
from jax.experimental.pallas import tpu as pltpu

# ----- small, module-consistent shapes -----
B, S, H = 2, 8, 32          # batch, seq_len, hidden_size
NUM_HEADS = 4
HEAD_DIM = H // NUM_HEADS
INTER = 64                  # intermediate_size
NUM_LAYERS = 2              # num_hidden_layers
LN_EPS = 1e-5               # layer_norm_eps

BS = B * S                  # batch folded into matmul rows
W1_COLS = 3 * H + H + INTER # packed [Wq|Wk|Wv|Wo|Wi] along the lane axis
VEC_ROWS = 5                # packed bias / LN / head-mask slab rows
VEC_COLS = 3 * H

# Matmul input dtype. Set to jnp.bfloat16 on v6e/v7x at production sizes
# (accumulation stays f32 via preferred_element_type); f32 here for exactness.
MM_DTYPE = jnp.float32


# ---------------- in-kernel math helpers ----------------
def _erf(x):
    # Abramowitz & Stegun 7.1.26 polynomial erf (max abs err ~1.5e-7).
    a1, a2, a3, a4, a5 = (0.254829592, -0.284496736, 1.421413741,
                          -1.453152027, 1.061405429)
    p = 0.3275911
    s = jnp.where(x >= 0.0, 1.0, -1.0)
    ax = jnp.abs(x)
    t = 1.0 / (1.0 + p * ax)
    poly = ((((a5 * t + a4) * t + a3) * t + a2) * t + a1) * t
    return s * (1.0 - poly * jnp.exp(-ax * ax))


def _gelu(x):
    # matches reference gelu(x) = x * 0.5 * (1 + erf(x / sqrt(2)))
    return x * 0.5 * (1.0 + _erf(x * (1.0 / math.sqrt(2.0))))


def _layer_norm(x, gamma, beta):
    mu = jnp.mean(x, axis=-1, keepdims=True)
    d = x - mu
    var = jnp.mean(d * d, axis=-1, keepdims=True)
    return d * lax.rsqrt(var + LN_EPS) * gamma + beta


# ---------------- the fused Pallas kernel: all layers, whole batch ----------------
def roberta_encoder_kernel(x_ref,      # (BS, H)      initial hidden states
                           mask_ref,   # (BS, BS)     block-diag + padding additive mask
                           w1_ref,     # (1, H, W1_COLS)  [Wq|Wk|Wv|Wo|Wi] for this layer
                           w2_ref,     # (1, INTER, H)
                           vec_ref,    # (1, VEC_ROWS, VEC_COLS) biases/LN/head-mask
                           out_ref,    # (1, BS, H)   this layer's encoded output
                           hid_ref):   # VMEM scratch (BS, H) f32: layer-to-layer carry
    @pl.when(pl.program_id(0) == 0)
    def _():
        hid_ref[...] = x_ref[...]

    x = hid_ref[...]                               # (BS, H) f32
    mask = mask_ref[...]                           # (BS, BS) additive
    W1 = w1_ref[0]                                 # (H, W1_COLS)
    W2 = w2_ref[0]                                 # (INTER, H)
    V = vec_ref[0]                                 # (VEC_ROWS, VEC_COLS)

    # static slices of the packed vector slab
    b_qkv = V[0:1, :]                              # (1, 3H) = bq|bk|bv
    b_o, g1, be1 = V[1:2, 0:H], V[1:2, H:2 * H], V[1:2, 2 * H:3 * H]
    b_i = V[2:3, 0:INTER]
    b_2, g2, be2 = V[3:4, 0:H], V[3:4, H:2 * H], V[3:4, 2 * H:3 * H]
    hm = V[4:5, 0:H]                               # head_mask, expanded per head-dim

    # --- RobertaSelfAttention: fused QKV projection for the whole batch ---
    qkv = jnp.dot(x.astype(MM_DTYPE), W1[:, 0:3 * H].astype(MM_DTYPE),
                  preferred_element_type=jnp.float32) + b_qkv     # (BS, 3H)
    inv_sqrt_d = jnp.float32(1.0 / math.sqrt(HEAD_DIM))
    q = qkv[:, 0:H] * inv_sqrt_d                   # score scale folded into q (1 mul)
    k = qkv[:, H:2 * H]
    v = qkv[:, 2 * H:3 * H] * hm                   # head_mask folded into values

    ctx_heads = []
    for h in range(NUM_HEADS):                     # static unroll (tiny trip count)
        lo, hi = h * HEAD_DIM, (h + 1) * HEAD_DIM
        qh, kh, vh = q[:, lo:hi], k[:, lo:hi], v[:, lo:hi]
        s = lax.dot_general(qh.astype(MM_DTYPE), kh.astype(MM_DTYPE),
                            (((1,), (1,)), ((), ())),
                            preferred_element_type=jnp.float32)   # (BS, BS)
        s = s + mask
        s = s - jnp.max(s, axis=-1, keepdims=True)
        p = jnp.exp(s)
        p = p * pl.reciprocal(jnp.sum(p, axis=-1, keepdims=True), approx=False)
        ctx_heads.append(jnp.dot(p.astype(MM_DTYPE), vh.astype(MM_DTYPE),
                                 preferred_element_type=jnp.float32))
    ctx = jnp.concatenate(ctx_heads, axis=-1)      # (BS, H), single lane-dense value

    # --- RobertaSelfOutput: dense + residual + LayerNorm ---
    attn = jnp.dot(ctx.astype(MM_DTYPE), W1[:, 3 * H:4 * H].astype(MM_DTYPE),
                   preferred_element_type=jnp.float32) + b_o
    h1 = _layer_norm(attn + x, g1, be1)

    # --- RobertaIntermediate (gelu) + RobertaOutput: dense + residual + LayerNorm ---
    inter = _gelu(jnp.dot(h1.astype(MM_DTYPE), W1[:, 4 * H:].astype(MM_DTYPE),
                          preferred_element_type=jnp.float32) + b_i)
    ffn = jnp.dot(inter.astype(MM_DTYPE), W2.astype(MM_DTYPE),
                  preferred_element_type=jnp.float32) + b_2
    out = _layer_norm(ffn + h1, g2, be2)

    hid_ref[...] = out                             # carry to next layer (stays in VMEM)
    out_ref[0] = out.astype(out_ref.dtype)


# ---------------- wrapper: pack weights, build mask, call the kernel ----------------
def pack_layer_params(layer_params, head_mask):
    """Pack per-layer params into 3 stacked slabs (fewer, larger DMAs)."""
    w1 = jnp.stack([jnp.concatenate(
        [p["wq"], p["wk"], p["wv"], p["wo"], p["wi"]], axis=1)
        for p in layer_params])                                   # (L, H, W1_COLS)
    w2 = jnp.stack([p["w2"] for p in layer_params])               # (L, INTER, H)

    def row(parts):
        vcat = jnp.concatenate([a.reshape(-1).astype(jnp.float32) for a in parts])
        return jnp.pad(vcat, (0, VEC_COLS - vcat.shape[0]))

    hm_exp = jnp.repeat(head_mask.astype(jnp.float32), HEAD_DIM, axis=-1)  # (L, H)
    vecs = jnp.stack([
        jnp.stack([row([p["bq"], p["bk"], p["bv"]]),
                   row([p["bo"], p["g1"], p["be1"]]),
                   row([p["bi"]]),
                   row([p["b2"], p["g2"], p["be2"]]),
                   row([hm_exp[i]])])
        for i, p in enumerate(layer_params)])                     # (L, VEC_ROWS, VEC_COLS)
    return w1.astype(jnp.float32), w2.astype(jnp.float32), vecs


def roberta_encoder(hidden, attn_mask, head_mask, layer_params,
                    output_all_encoded_layers=True):
    """Mirrors RobertaEncoder.forward: returns list of encoded layers.

    hidden: (B,S,H) f32.  attn_mask: (B,1,S) HF additive mask (0 / -10000).
    head_mask: (NUM_LAYERS, NUM_HEADS)."""
    num_layers = len(layer_params)
    w1, w2, vecs = pack_layer_params(layer_params, head_mask)

    x2d = hidden.reshape(BS, H).astype(jnp.float32)

    # Block-diagonal batch mask (queries attend only their own batch element's
    # keys; cross-batch pairs get -1e9, which underflows to prob 0.0) plus the
    # per-key additive padding mask, materialized once for the folded layout.
    cross = jnp.kron(1.0 - jnp.eye(B, dtype=jnp.float32),
                     jnp.ones((S, S), jnp.float32)) * jnp.float32(-1e9)
    full_mask = cross + jnp.broadcast_to(
        attn_mask.reshape(1, BS).astype(jnp.float32), (BS, BS))

    grid_spec = pltpu.PrefetchScalarGridSpec(
        num_scalar_prefetch=0,
        grid=(num_layers,),
        in_specs=[
            pl.BlockSpec((BS, H), lambda l: (0, 0)),               # hidden (fetched once)
            pl.BlockSpec((BS, BS), lambda l: (0, 0)),              # additive mask
            pl.BlockSpec((1, H, W1_COLS), lambda l: (l, 0, 0)),    # packed big weights
            pl.BlockSpec((1, INTER, H), lambda l: (l, 0, 0)),      # FFN out weight
            pl.BlockSpec((1, VEC_ROWS, VEC_COLS), lambda l: (l, 0, 0)),  # biases/LN/hm
        ],
        out_specs=pl.BlockSpec((1, BS, H), lambda l: (l, 0, 0)),
        scratch_shapes=[pltpu.VMEM((BS, H), jnp.float32)],         # layer-to-layer carry
    )

    stacked = pl.pallas_call(
        roberta_encoder_kernel,
        out_shape=jax.ShapeDtypeStruct((num_layers, BS, H), jnp.float32),
        grid_spec=grid_spec,
        # layer axis is a sequential dependency (hidden state carried in VMEM)
        compiler_params=pltpu.CompilerParams(dimension_semantics=("arbitrary",)),
    )(x2d, full_mask, w1, w2, vecs)

    stacked = stacked.reshape(num_layers, B, S, H)
    if output_all_encoded_layers:
        return [stacked[i] for i in range(num_layers)]
    return [stacked[-1]]


# ---------------- deterministic parameter init ----------------
def init_layer_params(key):
    ks = jax.random.split(key, 16)

    def lin(k, fi, fo):
        return 0.02 * jax.random.normal(k, (fi, fo), jnp.float32)

    def vec(k, n, scale=0.1):
        return scale * jax.random.normal(k, (n,), jnp.float32)

    return {
        "wq": lin(ks[0], H, H), "bq": vec(ks[1], H),
        "wk": lin(ks[2], H, H), "bk": vec(ks[3], H),
        "wv": lin(ks[4], H, H), "bv": vec(ks[5], H),
        "wo": lin(ks[6], H, H), "bo": vec(ks[7], H),
        "g1": 1.0 + vec(ks[8], H), "be1": vec(ks[9], H),
        "wi": lin(ks[10], H, INTER), "bi": vec(ks[11], INTER),
        "w2": lin(ks[12], INTER, H), "b2": vec(ks[13], H),
        "g2": 1.0 + vec(ks[14], H), "be2": vec(ks[15], H),
    }


# ---------------- pure-JAX reference (sanity check of the same math) ----------------
def reference_layer(x, attn_mask, head_mask_l, p):
    q = (x @ p["wq"] + p["bq"]).reshape(B, S, NUM_HEADS, HEAD_DIM).transpose(0, 2, 1, 3)
    k = (x @ p["wk"] + p["bk"]).reshape(B, S, NUM_HEADS, HEAD_DIM).transpose(0, 2, 1, 3)
    v = (x @ p["wv"] + p["bv"]).reshape(B, S, NUM_HEADS, HEAD_DIM).transpose(0, 2, 1, 3)
    scores = jnp.einsum("bhqd,bhkd->bhqk", q, k) / math.sqrt(HEAD_DIM)
    scores = scores + attn_mask[:, :, None, :]          # (B,1,1,S) broadcast
    probs = jax.nn.softmax(scores, axis=-1) * head_mask_l[None, :, None, None]
    ctx = jnp.einsum("bhqk,bhkd->bhqd", probs, v).transpose(0, 2, 1, 3).reshape(B, S, H)

    def ln(y, g, b):
        mu = y.mean(-1, keepdims=True)
        var = ((y - mu) ** 2).mean(-1, keepdims=True)
        return (y - mu) / jnp.sqrt(var + LN_EPS) * g + b

    h1 = ln(ctx @ p["wo"] + p["bo"] + x, p["g1"], p["be1"])
    inter = h1 @ p["wi"] + p["bi"]
    inter = inter * 0.5 * (1.0 + jax.scipy.special.erf(inter / math.sqrt(2.0)))
    return ln(inter @ p["w2"] + p["b2"] + h1, p["g2"], p["be2"])


if __name__ == "__main__":
    key = jax.random.PRNGKey(0)
    k_x, k_p = jax.random.split(key)

    hidden = jax.random.normal(k_x, (B, S, H), jnp.float32)
    # keep-mask: last 2 key positions of batch element 1 are padding
    keep = jnp.ones((B, S), jnp.float32).at[1, -2:].set(0.0)
    attn_mask = ((1.0 - keep) * -10000.0).reshape(B, 1, S)
    # non-trivial head mask (incl. a fully-masked head) to exercise that path
    head_mask = jnp.array([[1.0, 1.0, 0.5, 1.0],
                           [1.0, 0.0, 1.0, 1.0]], jnp.float32)

    layer_params = [init_layer_params(jax.random.fold_in(k_p, i))
                    for i in range(NUM_LAYERS)]

    outs = roberta_encoder(hidden, attn_mask, head_mask, layer_params,
                           output_all_encoded_layers=True)
    outs = jax.block_until_ready(outs)

    # sanity check every encoded layer vs pure-JAX reference of the same math
    ref = hidden
    for i in range(NUM_LAYERS):
        ref = reference_layer(ref, attn_mask, head_mask[i], layer_params[i])
        assert jnp.allclose(outs[i], ref, rtol=1e-3, atol=1e-3), f"mismatch layer {i}"

    print("KERNEL_OK")
</pallas_src>

<mosaic_0001>
module attributes {stable_mosaic.version = 11 : i64} {
  func.func @roberta_encoder_kernel(%arg0: i32, %arg1: memref<16x32xf32, #tpu.memory_space<vmem>>, %arg2: memref<16x16xf32, #tpu.memory_space<vmem>>, %arg3: memref<1x32x192xf32, #tpu.memory_space<vmem>>, %arg4: memref<1x64x32xf32, #tpu.memory_space<vmem>>, %arg5: memref<1x5x96xf32, #tpu.memory_space<vmem>>, %arg6: memref<1x16x32xf32, #tpu.memory_space<vmem>>, %arg7: memref<16x32xf32, #tpu.memory_space<vmem>>) attributes {dimension_semantics = [#tpu.dimension_semantics<arbitrary>], iteration_bounds = array<i64: 2>, scalar_prefetch = 0 : i64, scratch_operands = 1 : i64, tpu.core_type = #tpu.core_type<tc>, window_params = [{pipeline_mode = #tpu.pipeline_mode<synchronous>, transform_indices = @transform_0, window_bounds = array<i64: 16, 32>}, {pipeline_mode = #tpu.pipeline_mode<synchronous>, transform_indices = @transform_1, window_bounds = array<i64: 16, 16>}, {transform_indices = @transform_2, window_bounds = array<i64: 1, 32, 192>}, {transform_indices = @transform_3, window_bounds = array<i64: 1, 64, 32>}, {transform_indices = @transform_4, window_bounds = array<i64: 1, 5, 96>}, {transform_indices = @transform_5, window_bounds = array<i64: 1, 16, 32>}]} {
    %c0_i32 = arith.constant 0 : i32
    %0 = arith.cmpi eq, %arg0, %c0_i32 : i32
    %1 = arith.extui %0 : i1 to i32
    %c0_i32_0 = arith.constant 0 : i32
    %2 = arith.cmpi ne, %1, %c0_i32_0 : i32
    scf.if %2 {
      %c0_64 = arith.constant 0 : index
      %c0_65 = arith.constant 0 : index
      %194 = vector.load %arg1[%c0_64, %c0_65] : memref<16x32xf32, #tpu.memory_space<vmem>>, vector<16x32xf32>
      %c0_66 = arith.constant 0 : index
      %c0_67 = arith.constant 0 : index
      %195 = vector.load %arg7[%c0_66, %c0_67] : memref<16x32xf32, #tpu.memory_space<vmem>>, vector<16x32xf32>
      tpu.vector_store %arg7[%c0_66, %c0_67], %194 {strides = array<i32>} : memref<16x32xf32, #tpu.memory_space<vmem>>, vector<16x32xf32>,
    } else {
    }
    %c0 = arith.constant 0 : index
    %c0_1 = arith.constant 0 : index
    %3 = vector.load %arg7[%c0, %c0_1] : memref<16x32xf32, #tpu.memory_space<vmem>>, vector<16x32xf32>
    %c0_2 = arith.constant 0 : index
    %c0_3 = arith.constant 0 : index
    %4 = vector.load %arg2[%c0_2, %c0_3] : memref<16x16xf32, #tpu.memory_space<vmem>>, vector<16x16xf32>
    %c0_4 = arith.constant 0 : index
    %c0_5 = arith.constant 0 : index
    %c0_6 = arith.constant 0 : index
    %5 = vector.load %arg3[%c0_4, %c0_5, %c0_6] : memref<1x32x192xf32, #tpu.memory_space<vmem>>, vector<1x32x192xf32>
    %6 = vector.shape_cast %5 : vector<1x32x192xf32> to vector<32x192xf32>
    %c0_7 = arith.constant 0 : index
    %c0_8 = arith.constant 0 : index
    %c0_9 = arith.constant 0 : index
    %7 = vector.load %arg4[%c0_7, %c0_8, %c0_9] : memref<1x64x32xf32, #tpu.memory_space<vmem>>, vector<1x64x32xf32>
    %8 = vector.shape_cast %7 : vector<1x64x32xf32> to vector<64x32xf32>
    %c0_10 = arith.constant 0 : index
    %c0_11 = arith.constant 0 : index
    %c0_12 = arith.constant 0 : index
    %9 = vector.load %arg5[%c0_10, %c0_11, %c0_12] : memref<1x5x96xf32, #tpu.memory_space<vmem>>, vector<1x5x96xf32>
    %10 = vector.shape_cast %9 : vector<1x5x96xf32> to vector<5x96xf32>
    %11 = vector.extract_strided_slice %10 {offsets = [0, 0], sizes = [1, 96], strides = [1, 1]} : vector<5x96xf32> to vector<1x96xf32>
    %12 = vector.extract_strided_slice %10 {offsets = [1, 0], sizes = [1, 32], strides = [1, 1]} : vector<5x96xf32> to vector<1x32xf32>
    %13 = vector.extract_strided_slice %10 {offsets = [1, 32], sizes = [1, 32], strides = [1, 1]} : vector<5x96xf32> to vector<1x32xf32>
    %14 = vector.extract_strided_slice %10 {offsets = [1, 64], sizes = [1, 32], strides = [1, 1]} : vector<5x96xf32> to vector<1x32xf32>
    %15 = vector.extract_strided_slice %10 {offsets = [2, 0], sizes = [1, 64], strides = [1, 1]} : vector<5x96xf32> to vector<1x64xf32>
    %16 = vector.extract_strided_slice %10 {offsets = [3, 0], sizes = [1, 32], strides = [1, 1]} : vector<5x96xf32> to vector<1x32xf32>
    %17 = vector.extract_strided_slice %10 {offsets = [3, 32], sizes = [1, 32], strides = [1, 1]} : vector<5x96xf32> to vector<1x32xf32>
    %18 = vector.extract_strided_slice %10 {offsets = [3, 64], sizes = [1, 32], strides = [1, 1]} : vector<5x96xf32> to vector<1x32xf32>
    %19 = vector.extract_strided_slice %10 {offsets = [4, 0], sizes = [1, 32], strides = [1, 1]} : vector<5x96xf32> to vector<1x32xf32>
    %20 = vector.extract_strided_slice %6 {offsets = [0, 0], sizes = [32, 96], strides = [1, 1]} : vector<32x192xf32> to vector<32x96xf32>
    %cst = arith.constant dense<0.000000e+00> : vector<16x96xf32>
    %21 = tpu.matmul %3, %20, %cst {dimension_numbers = #tpu.dot_dimension_numbers<[1], [0], [0], [1], [0, 0, 1, 1], [], []>} : vector<16x32xf32>, vector<32x96xf32>, vector<16x96xf32> -> vector<16x96xf32>
    %22 = vector.broadcast %11 : vector<1x96xf32> to vector<16x96xf32>
    %23 = arith.addf %21, %22 : vector<16x96xf32>
    %24 = vector.extract_strided_slice %23 {offsets = [0, 0], sizes = [16, 32], strides = [1, 1]} : vector<16x96xf32> to vector<16x32xf32>
    %cst_13 = arith.constant 0.353553385 : f32
    %25 = vector.broadcast %cst_13 : f32 to vector<16x32xf32>
    %26 = arith.mulf %24, %25 : vector<16x32xf32>
    %27 = vector.extract_strided_slice %23 {offsets = [0, 32], sizes = [16, 32], strides = [1, 1]} : vector<16x96xf32> to vector<16x32xf32>
    %28 = vector.extract_strided_slice %23 {offsets = [0, 64], sizes = [16, 32], strides = [1, 1]} : vector<16x96xf32> to vector<16x32xf32>
    %29 = vector.broadcast %19 : vector<1x32xf32> to vector<16x32xf32>
    %30 = arith.mulf %28, %29 : vector<16x32xf32>
    %31 = vector.extract_strided_slice %26 {offsets = [0, 0], sizes = [16, 8], strides = [1, 1]} : vector<16x32xf32> to vector<16x8xf32>
    %32 = vector.extract_strided_slice %27 {offsets = [0, 0], sizes = [16, 8], strides = [1, 1]} : vector<16x32xf32> to vector<16x8xf32>
    %33 = vector.extract_strided_slice %30 {offsets = [0, 0], sizes = [16, 8], strides = [1, 1]} : vector<16x32xf32> to vector<16x8xf32>
    %cst_14 = arith.constant dense<0.000000e+00> : vector<16x16xf32>
    %34 = tpu.matmul %31, %32, %cst_14 {dimension_numbers = #tpu.dot_dimension_numbers<[1], [1], [0], [0], [0, 0, 1, 0], [], []>} : vector<16x8xf32>, vector<16x8xf32>, vector<16x16xf32> -> vector<16x16xf32>
    %35 = arith.addf %34, %4 : vector<16x16xf32>
    %cst_15 = arith.constant dense<0xFF800000> : vector<16xf32>
    %36 = vector.multi_reduction <maximumf>, %35, %cst_15 [1] : vector<16x16xf32> to vector<16xf32>
    %37 = vector.shape_cast %36 : vector<16xf32> to vector<16x1xf32>
    %38 = vector.broadcast %37 : vector<16x1xf32> to vector<16x16xf32>
    %39 = arith.subf %35, %38 : vector<16x16xf32>
    %40 = math.exp %39 : vector<16x16xf32>
    %cst_16 = arith.constant dense<0.000000e+00> : vector<16xf32>
    %41 = vector.multi_reduction <add>, %40, %cst_16 [1] : vector<16x16xf32> to vector<16xf32>
    %42 = vector.shape_cast %41 : vector<16xf32> to vector<16x1xf32>
    %43 = tpu.reciprocal %42 : vector<16x1xf32> -> vector<16x1xf32>
    %44 = vector.broadcast %43 : vector<16x1xf32> to vector<16x16xf32>
    %45 = arith.mulf %40, %44 : vector<16x16xf32>
    %cst_17 = arith.constant dense<0.000000e+00> : vector<16x8xf32>
    %46 = tpu.matmul %45, %33, %cst_17 {dimension_numbers = #tpu.dot_dimension_numbers<[1], [0], [0], [1], [0, 0, 1, 1], [], []>} : vector<16x16xf32>, vector<16x8xf32>, vector<16x8xf32> -> vector<16x8xf32>
    %47 = vector.extract_strided_slice %26 {offsets = [0, 8], sizes = [16, 8], strides = [1, 1]} : vector<16x32xf32> to vector<16x8xf32>
    %48 = vector.extract_strided_slice %27 {offsets = [0, 8], sizes = [16, 8], strides = [1, 1]} : vector<16x32xf32> to vector<16x8xf32>
    %49 = vector.extract_strided_slice %30 {offsets = [0, 8], sizes = [16, 8], strides = [1, 1]} : vector<16x32xf32> to vector<16x8xf32>
    %cst_18 = arith.constant dense<0.000000e+00> : vector<16x16xf32>
    %50 = tpu.matmul %47, %48, %cst_18 {dimension_numbers = #tpu.dot_dimension_numbers<[1], [1], [0], [0], [0, 0, 1, 0], [], []>} : vector<16x8xf32>, vector<16x8xf32>, vector<16x16xf32> -> vector<16x16xf32>
    %51 = arith.addf %50, %4 : vector<16x16xf32>
    %cst_19 = arith.constant dense<0xFF800000> : vector<16xf32>
    %52 = vector.multi_reduction <maximumf>, %51, %cst_19 [1] : vector<16x16xf32> to vector<16xf32>
    %53 = vector.shape_cast %52 : vector<16xf32> to vector<16x1xf32>
    %54 = vector.broadcast %53 : vector<16x1xf32> to vector<16x16xf32>
    %55 = arith.subf %51, %54 : vector<16x16xf32>
    %56 = math.exp %55 : vector<16x16xf32>
    %cst_20 = arith.constant dense<0.000000e+00> : vector<16xf32>
    %57 = vector.multi_reduction <add>, %56, %cst_20 [1] : vector<16x16xf32> to vector<16xf32>
    %58 = vector.shape_cast %57 : vector<16xf32> to vector<16x1xf32>
    %59 = tpu.reciprocal %58 : vector<16x1xf32> -> vector<16x1xf32>
    %60 = vector.broadcast %59 : vector<16x1xf32> to vector<16x16xf32>
    %61 = arith.mulf %56, %60 : vector<16x16xf32>
    %cst_21 = arith.constant dense<0.000000e+00> : vector<16x8xf32>
    %62 = tpu.matmul %61, %49, %cst_21 {dimension_numbers = #tpu.dot_dimension_numbers<[1], [0], [0], [1], [0, 0, 1, 1], [], []>} : vector<16x16xf32>, vector<16x8xf32>, vector<16x8xf32> -> vector<16x8xf32>
    %63 = vector.extract_strided_slice %26 {offsets = [0, 16], sizes = [16, 8], strides = [1, 1]} : vector<16x32xf32> to vector<16x8xf32>
    %64 = vector.extract_strided_slice %27 {offsets = [0, 16], sizes = [16, 8], strides = [1, 1]} : vector<16x32xf32> to vector<16x8xf32>
    %65 = vector.extract_strided_slice %30 {offsets = [0, 16], sizes = [16, 8], strides = [1, 1]} : vector<16x32xf32> to vector<16x8xf32>
    %cst_22 = arith.constant dense<0.000000e+00> : vector<16x16xf32>
    %66 = tpu.matmul %63, %64, %cst_22 {dimension_numbers = #tpu.dot_dimension_numbers<[1], [1], [0], [0], [0, 0, 1, 0], [], []>} : vector<16x8xf32>, vector<16x8xf32>, vector<16x16xf32> -> vector<16x16xf32>
    %67 = arith.addf %66, %4 : vector<16x16xf32>
    %cst_23 = arith.constant dense<0xFF800000> : vector<16xf32>
    %68 = vector.multi_reduction <maximumf>, %67, %cst_23 [1] : vector<16x16xf32> to vector<16xf32>
    %69 = vector.shape_cast %68 : vector<16xf32> to vector<16x1xf32>
    %70 = vector.broadcast %69 : vector<16x1xf32> to vector<16x16xf32>
    %71 = arith.subf %67, %70 : vector<16x16xf32>
    %72 = math.exp %71 : vector<16x16xf32>
    %cst_24 = arith.constant dense<0.000000e+00> : vector<16xf32>
    %73 = vector.multi_reduction <add>, %72, %cst_24 [1] : vector<16x16xf32> to vector<16xf32>
    %74 = vector.shape_cast %73 : vector<16xf32> to vector<16x1xf32>
    %75 = tpu.reciprocal %74 : vector<16x1xf32> -> vector<16x1xf32>
    %76 = vector.broadcast %75 : vector<16x1xf32> to vector<16x16xf32>
    %77 = arith.mulf %72, %76 : vector<16x16xf32>
    %cst_25 = arith.constant dense<0.000000e+00> : vector<16x8xf32>
    %78 = tpu.matmul %77, %65, %cst_25 {dimension_numbers = #tpu.dot_dimension_numbers<[1], [0], [0], [1], [0, 0, 1, 1], [], []>} : vector<16x16xf32>, vector<16x8xf32>, vector<16x8xf32> -> vector<16x8xf32>
    %79 = vector.extract_strided_slice %26 {offsets = [0, 24], sizes = [16, 8], strides = [1, 1]} : vector<16x32xf32> to vector<16x8xf32>
    %80 = vector.extract_strided_slice %27 {offsets = [0, 24], sizes = [16, 8], strides = [1, 1]} : vector<16x32xf32> to vector<16x8xf32>
    %81 = vector.extract_strided_slice %30 {offsets = [0, 24], sizes = [16, 8], strides = [1, 1]} : vector<16x32xf32> to vector<16x8xf32>
    %cst_26 = arith.constant dense<0.000000e+00> : vector<16x16xf32>
    %82 = tpu.matmul %79, %80, %cst_26 {dimension_numbers = #tpu.dot_dimension_numbers<[1], [1], [0], [0], [0, 0, 1, 0], [], []>} : vector<16x8xf32>, vector<16x8xf32>, vector<16x16xf32> -> vector<16x16xf32>
    %83 = arith.addf %82, %4 : vector<16x16xf32>
    %cst_27 = arith.constant dense<0xFF800000> : vector<16xf32>
    %84 = vector.multi_reduction <maximumf>, %83, %cst_27 [1] : vector<16x16xf32> to vector<16xf32>
    %85 = vector.shape_cast %84 : vector<16xf32> to vector<16x1xf32>
    %86 = vector.broadcast %85 : vector<16x1xf32> to vector<16x16xf32>
    %87 = arith.subf %83, %86 : vector<16x16xf32>
    %88 = math.exp %87 : vector<16x16xf32>
    %cst_28 = arith.constant dense<0.000000e+00> : vector<16xf32>
    %89 = vector.multi_reduction <add>, %88, %cst_28 [1] : vector<16x16xf32> to vector<16xf32>
    %90 = vector.shape_cast %89 : vector<16xf32> to vector<16x1xf32>
    %91 = tpu.reciprocal %90 : vector<16x1xf32> -> vector<16x1xf32>
    %92 = vector.broadcast %91 : vector<16x1xf32> to vector<16x16xf32>
    %93 = arith.mulf %88, %92 : vector<16x16xf32>
    %cst_29 = arith.constant dense<0.000000e+00> : vector<16x8xf32>
    %94 = tpu.matmul %93, %81, %cst_29 {dimension_numbers = #tpu.dot_dimension_numbers<[1], [0], [0], [1], [0, 0, 1, 1], [], []>} : vector<16x16xf32>, vector<16x8xf32>, vector<16x8xf32> -> vector<16x8xf32>
    %95 = tpu.concatenate %46, %62, %78, %94 in 1 : vector<16x8xf32>, vector<16x8xf32>, vector<16x8xf32>, vector<16x8xf32> -> vector<16x32xf32>
    %96 = vector.extract_strided_slice %6 {offsets = [0, 96], sizes = [32, 32], strides = [1, 1]} : vector<32x192xf32> to vector<32x32xf32>
    %cst_30 = arith.constant dense<0.000000e+00> : vector<16x32xf32>
    %97 = tpu.matmul %95, %96, %cst_30 {dimension_numbers = #tpu.dot_dimension_numbers<[1], [0], [0], [1], [0, 0, 1, 1], [], []>} : vector<16x32xf32>, vector<32x32xf32>, vector<16x32xf32> -> vector<16x32xf32>
    %98 = vector.broadcast %12 : vector<1x32xf32> to vector<16x32xf32>
    %99 = arith.addf %97, %98 : vector<16x32xf32>
    %100 = arith.addf %99, %3 : vector<16x32xf32>
    %cst_31 = arith.constant dense<0.000000e+00> : vector<16xf32>
    %101 = vector.multi_reduction <add>, %100, %cst_31 [1] : vector<16x32xf32> to vector<16xf32>
    %102 = vector.shape_cast %101 : vector<16xf32> to vector<16x1xf32>
    %cst_32 = arith.constant 3.200000e+01 : f32
    %103 = vector.broadcast %cst_32 : f32 to vector<16x1xf32>
    %104 = arith.divf %102, %103 : vector<16x1xf32>
    %105 = vector.broadcast %104 : vector<16x1xf32> to vector<16x32xf32>
    %106 = arith.subf %100, %105 : vector<16x32xf32>
    %107 = arith.mulf %106, %106 : vector<16x32xf32>
    %cst_33 = arith.constant dense<0.000000e+00> : vector<16xf32>
    %108 = vector.multi_reduction <add>, %107, %cst_33 [1] : vector<16x32xf32> to vector<16xf32>
    %109 = vector.shape_cast %108 : vector<16xf32> to vector<16x1xf32>
    %cst_34 = arith.constant 3.200000e+01 : f32
    %110 = vector.broadcast %cst_34 : f32 to vector<16x1xf32>
    %111 = arith.divf %109, %110 : vector<16x1xf32>
    %cst_35 = arith.constant 9.99999974E-6 : f32
    %112 = vector.broadcast %cst_35 : f32 to vector<16x1xf32>
    %113 = arith.addf %111, %112 : vector<16x1xf32>
    %114 = math.rsqrt %113 : vector<16x1xf32>
    %115 = vector.broadcast %114 : vector<16x1xf32> to vector<16x32xf32>
    %116 = arith.mulf %106, %115 : vector<16x32xf32>
    %117 = vector.broadcast %13 : vector<1x32xf32> to vector<16x32xf32>
    %118 = arith.mulf %116, %117 : vector<16x32xf32>
    %119 = vector.broadcast %14 : vector<1x32xf32> to vector<16x32xf32>
    %120 = arith.addf %118, %119 : vector<16x32xf32>
    %121 = vector.extract_strided_slice %6 {offsets = [0, 128], sizes = [32, 64], strides = [1, 1]} : vector<32x192xf32> to vector<32x64xf32>
    %cst_36 = arith.constant dense<0.000000e+00> : vector<16x64xf32>
    %122 = tpu.matmul %120, %121, %cst_36 {dimension_numbers = #tpu.dot_dimension_numbers<[1], [0], [0], [1], [0, 0, 1, 1], [], []>} : vector<16x32xf32>, vector<32x64xf32>, vector<16x64xf32> -> vector<16x64xf32>
    %123 = vector.broadcast %15 : vector<1x64xf32> to vector<16x64xf32>
    %124 = arith.addf %122, %123 : vector<16x64xf32>
    %cst_37 = arith.constant 5.000000e-01 : f32
    %125 = vector.broadcast %cst_37 : f32 to vector<16x64xf32>
    %126 = arith.mulf %124, %125 : vector<16x64xf32>
    %cst_38 = arith.constant 0.707106769 : f32
    %127 = vector.broadcast %cst_38 : f32 to vector<16x64xf32>
    %128 = arith.mulf %124, %127 : vector<16x64xf32>
    %cst_39 = arith.constant 0.000000e+00 : f32
    %129 = vector.broadcast %cst_39 : f32 to vector<16x64xf32>
    %130 = arith.cmpf oge, %128, %129 : vector<16x64xf32>
    %cst_40 = arith.constant 1.000000e+00 : f32
    %cst_41 = arith.constant -1.000000e+00 : f32
    %131 = vector.broadcast %cst_40 : f32 to vector<16x64xf32>
    %132 = vector.broadcast %cst_41 : f32 to vector<16x64xf32>
    %133 = arith.select %130, %131, %132 : vector<16x64xi1>, vector<16x64xf32>
    %134 = math.absf %128 : vector<16x64xf32>
    %cst_42 = arith.constant 0.327591091 : f32
    %135 = vector.broadcast %cst_42 : f32 to vector<16x64xf32>
    %136 = arith.mulf %135, %134 : vector<16x64xf32>
    %cst_43 = arith.constant 1.000000e+00 : f32
    %137 = vector.broadcast %cst_43 : f32 to vector<16x64xf32>
    %138 = arith.addf %137, %136 : vector<16x64xf32>
    %cst_44 = arith.constant 1.000000e+00 : f32
    %139 = vector.broadcast %cst_44 : f32 to vector<16x64xf32>
    %140 = arith.divf %139, %138 : vector<16x64xf32>
    %cst_45 = arith.constant 1.06140542 : f32
    %141 = vector.broadcast %cst_45 : f32 to vector<16x64xf32>
    %142 = arith.mulf %141, %140 : vector<16x64xf32>
    %cst_46 = arith.constant -1.45315206 : f32
    %143 = vector.broadcast %cst_46 : f32 to vector<16x64xf32>
    %144 = arith.addf %142, %143 : vector<16x64xf32>
    %145 = arith.mulf %144, %140 : vector<16x64xf32>
    %cst_47 = arith.constant 1.42141378 : f32
    %146 = vector.broadcast %cst_47 : f32 to vector<16x64xf32>
    %147 = arith.addf %145, %146 : vector<16x64xf32>
    %148 = arith.mulf %147, %140 : vector<16x64xf32>
    %cst_48 = arith.constant -0.284496725 : f32
    %149 = vector.broadcast %cst_48 : f32 to vector<16x64xf32>
    %150 = arith.addf %148, %149 : vector<16x64xf32>
    %151 = arith.mulf %150, %140 : vector<16x64xf32>
    %cst_49 = arith.constant 0.254829586 : f32
    %152 = vector.broadcast %cst_49 : f32 to vector<16x64xf32>
    %153 = arith.addf %151, %152 : vector<16x64xf32>
    %154 = arith.mulf %153, %140 : vector<16x64xf32>
    %cst_50 = arith.constant 0.000000e+00 : f32
    %155 = vector.broadcast %cst_50 : f32 to vector<16x64xf32>
    %156 = arith.subf %155, %134 : vector<16x64xf32>
    %157 = arith.mulf %156, %134 : vector<16x64xf32>
    %158 = math.exp %157 : vector<16x64xf32>
    %159 = arith.mulf %154, %158 : vector<16x64xf32>
    %cst_51 = arith.constant 1.000000e+00 : f32
    %160 = vector.broadcast %cst_51 : f32 to vector<16x64xf32>
    %161 = arith.subf %160, %159 : vector<16x64xf32>
    %162 = arith.mulf %133, %161 : vector<16x64xf32>
    %cst_52 = arith.constant 1.000000e+00 : f32
    %163 = vector.broadcast %cst_52 : f32 to vector<16x64xf32>
    %164 = arith.addf %163, %162 : vector<16x64xf32>
    %165 = arith.mulf %126, %164 : vector<16x64xf32>
    %cst_53 = arith.constant dense<0.000000e+00> : vector<16x32xf32>
    %166 = tpu.matmul %165, %8, %cst_53 {dimension_numbers = #tpu.dot_dimension_numbers<[1], [0], [0], [1], [0, 0, 1, 1], [], []>} : vector<16x64xf32>, vector<64x32xf32>, vector<16x32xf32> -> vector<16x32xf32>
    %167 = vector.broadcast %16 : vector<1x32xf32> to vector<16x32xf32>
    %168 = arith.addf %166, %167 : vector<16x32xf32>
    %169 = arith.addf %168, %120 : vector<16x32xf32>
    %cst_54 = arith.constant dense<0.000000e+00> : vector<16xf32>
    %170 = vector.multi_reduction <add>, %169, %cst_54 [1] : vector<16x32xf32> to vector<16xf32>
    %171 = vector.shape_cast %170 : vector<16xf32> to vector<16x1xf32>
    %cst_55 = arith.constant 3.200000e+01 : f32
    %172 = vector.broadcast %cst_55 : f32 to vector<16x1xf32>
    %173 = arith.divf %171, %172 : vector<16x1xf32>
    %174 = vector.broadcast %173 : vector<16x1xf32> to vector<16x32xf32>
    %175 = arith.subf %169, %174 : vector<16x32xf32>
    %176 = arith.mulf %175, %175 : vector<16x32xf32>
    %cst_56 = arith.constant dense<0.000000e+00> : vector<16xf32>
    %177 = vector.multi_reduction <add>, %176, %cst_56 [1] : vector<16x32xf32> to vector<16xf32>
    %178 = vector.shape_cast %177 : vector<16xf32> to vector<16x1xf32>
    %cst_57 = arith.constant 3.200000e+01 : f32
    %179 = vector.broadcast %cst_57 : f32 to vector<16x1xf32>
    %180 = arith.divf %178, %179 : vector<16x1xf32>
    %cst_58 = arith.constant 9.99999974E-6 : f32
    %181 = vector.broadcast %cst_58 : f32 to vector<16x1xf32>
    %182 = arith.addf %180, %181 : vector<16x1xf32>
    %183 = math.rsqrt %182 : vector<16x1xf32>
    %184 = vector.broadcast %183 : vector<16x1xf32> to vector<16x32xf32>
    %185 = arith.mulf %175, %184 : vector<16x32xf32>
    %186 = vector.broadcast %17 : vector<1x32xf32> to vector<16x32xf32>
    %187 = arith.mulf %185, %186 : vector<16x32xf32>
    %188 = vector.broadcast %18 : vector<1x32xf32> to vector<16x32xf32>
    %189 = arith.addf %187, %188 : vector<16x32xf32>
    %c0_59 = arith.constant 0 : index
    %c0_60 = arith.constant 0 : index
    %190 = vector.load %arg7[%c0_59, %c0_60] : memref<16x32xf32, #tpu.memory_space<vmem>>, vector<16x32xf32>
    tpu.vector_store %arg7[%c0_59, %c0_60], %189 {strides = array<i32>} : memref<16x32xf32, #tpu.memory_space<vmem>>, vector<16x32xf32>,
    %c0_61 = arith.constant 0 : index
    %c0_62 = arith.constant 0 : index
    %c0_63 = arith.constant 0 : index
    %191 = vector.load %arg6[%c0_61, %c0_62, %c0_63] : memref<1x16x32xf32, #tpu.memory_space<vmem>>, vector<1x16x32xf32>
    %192 = vector.shape_cast %191 : vector<1x16x32xf32> to vector<16x32xf32>
    %193 = vector.shape_cast %189 : vector<16x32xf32> to vector<1x16x32xf32>
    tpu.vector_store %arg6[%c0_61, %c0_62, %c0_63], %193 {strides = array<i32>} : memref<1x16x32xf32, #tpu.memory_space<vmem>>, vector<1x16x32xf32>,
    return
  }
  func.func @transform_0(%arg0: i32) -> (i32, i32) {
    %c0_i32 = arith.constant 0 : i32
    %c0_i32_0 = arith.constant 0 : i32
    %c0_i32_1 = arith.constant 0 : i32
    return %c0_i32, %c0_i32_0 : i32, i32
  }
  func.func @transform_1(%arg0: i32) -> (i32, i32) {
    %c0_i32 = arith.constant 0 : i32
    %c0_i32_0 = arith.constant 0 : i32
    %c0_i32_1 = arith.constant 0 : i32
    return %c0_i32, %c0_i32_0 : i32, i32
  }
  func.func @transform_2(%arg0: i32) -> (i32, i32, i32) {
    %c0_i32 = arith.constant 0 : i32
    %c0_i32_0 = arith.constant 0 : i32
    %c0_i32_1 = arith.constant 0 : i32
    return %arg0, %c0_i32, %c0_i32_0 : i32, i32, i32
  }
  func.func @transform_3(%arg0: i32) -> (i32, i32, i32) {
    %c0_i32 = arith.constant 0 : i32
    %c0_i32_0 = arith.constant 0 : i32
    %c0_i32_1 = arith.constant 0 : i32
    return %arg0, %c0_i32, %c0_i32_0 : i32, i32, i32
  }
  func.func @transform_4(%arg0: i32) -> (i32, i32, i32) {
    %c0_i32 = arith.constant 0 : i32
    %c0_i32_0 = arith.constant 0 : i32
    %c0_i32_1 = arith.constant 0 : i32
    return %arg0, %c0_i32, %c0_i32_0 : i32, i32, i32
  }
  func.func @transform_5(%arg0: i32) -> (i32, i32, i32) {
    %c0_i32 = arith.constant 0 : i32
    %c0_i32_0 = arith.constant 0 : i32
    %c0_i32_1 = arith.constant 0 : i32
    return %arg0, %c0_i32, %c0_i32_0 : i32, i32, i32
  }
}

</mosaic_0001>

<bundles_post_ra>
// kernel: tpu_custom_call.1
= control target key start
LH: loop header
LB: loop body
LE: loop exit
PB: predicated region body
PF: predicated region fallthrough
CT: control target
= control target key end

     0   :  { %10 = vsyncpa [#allocation4], 0  ;;  %s2511_s0 = inlined_call_operand.vmem [shape: f32[16,32], index: 0, kind: input, shape index: {}]   ;;  %s2512_s1 = inlined_call_operand.vmem [shape: f32[16,16], index: 1, kind: input, shape index: {}]   ;;  %s2513_s2 = inlined_call_operand.vmem [shape: f32[2,32,192], index: 2, kind: input, shape index: {}]   ;;  %s2514_s3 = inlined_call_operand.vmem [shape: f32[2,64,32], index: 3, kind: input, shape index: {}]   ;;  %s2515_s4 = inlined_call_operand.vmem [shape: f32[2,5,96], index: 4, kind: input, shape index: {}]   ;;  %s2516_s5 = inlined_call_operand.hbm [shape: f32[2,16,32], index: 5, kind: output, shape index: {}]  }
   0x1   :  { %12 = vsyncpa [#allocation4 + $0x1], 0  ;;  %s2165_s18 = smov 0   ;;  %s2167_s19 = smov 0  }
   0x2   :  { %s2169_s20 = smov 0   ;;  %s2171_s21 = smov 0  }
   0x3 LB: > { %s2186_s22 = sadd.s32 4294967295, %s2115_s21   ;;  %s1732_s23 = sadd.s32 4294967294, %s2115_s21   ;;  %s2115_s21 = sphi %s2171_s21, %s2522_s21   ;;  %s2111_s20 = sphi %s2169_s20, %s2521_s20   ;;  %s2107_s19 = sphi %s2167_s19, %s2520_s19   ;;  %s2103_s18 = sphi %s2165_s18, %s2519_s18  }
   0x4   : > { %s2190_s24 = sadd.s32 1, %s2115_s21   ;;  %s145_s25 = sadd.s32 1, %s2111_s20 }
   0x5   : > { %s142_s26 = ssub.s32 %s2115_s21, %s2190_s24  ;;  %p155_p0 = scmp.ne.s32.totalorder %s2111_s20, %s2107_s19 }
   0x6   : > { %p143_p1 = scmp.eq.s32.totalorder %s142_s26, 0  ;;  %p156_p2 = scmp.eq.s32.totalorder %s2186_s22, 1 }
   0x7   : > { %p161_p3 = scmp.ne.s32.totalorder %s2107_s19, %s2103_s18  ;;  %p162_p4 = scmp.eq.s32.totalorder %s1732_s23, 1 }
   0x8   : > { %s2201_s27 = scalar_select %p143_p1, %s2111_s20, %s145_s25  }
   0x9   : > { %p2203_p5 = por %p156_p2, %p155_p0  ;;  %p2207_p6 = por %p162_p4, %p161_p3 }
   0xa   : > { %p1735_p7 = scmp.ge.s32.totalorder %s2115_s21, 1  ;;  %p209_p8 = scmp.lt.s32.totalorder %s2115_s21, 3 }
   0xc   : > { %p210_p9 = pnand %p1735_p7, %p209_p8 }
   0xd   : > { %s243_s30 = sand.u32 (!%p210_p9), 1, %s2107_s19   ;;  %p246_p10 = scmp.lt.s32.totalorder (!%p210_p9), %s2186_s22, 1 }
   0xe   : > { %213 = sbr.rel (%p210_p9) target bundleno = 3508 (0xdb4), region = 40  ;;  %s1736_s6 = sshll.u32 (!%p210_p9), %s243_s30, 4 }
   0xf   : > { %s2231_s25 = scalar_lea.vmem (!%p210_p9), [#allocation3], %s1736_s6  ;;  %p1742_p11 = scmp.ne.s32.totalorder (!%p210_p9), %s2186_s22, 0 }
  0x13   : > { %s247_s7 = scalar_select %p246_p10, %s2186_s22, 1 }
  0x14   : > { %263 = sbr.rel (%p1742_p11) target bundleno = 27 (0x1b), region = 44 }
  0x15   : > { %s1780_s8 = sshll.u32 %s247_s7, 6  ;;  %s1741_s9 = sshll.u32 %s247_s7, 3 }
  0x16   : > { %s2221_s12 = scalar_lea.vmem %s2513_s2, %s1780_s8  ;;  %s2226_s15 = scalar_lea.vmem %s2514_s3, %s1780_s8 }
  0x17   : > { %s259_s23 = scalar_lea.vmem %s2515_s4, %s1741_s9 }
  0x19   : > { %v264_v0 = vld [vmem:[%s2511_s0] sm:$0xff]  ;;  %vm266_vm0 = vcmask 261120   ;;  %v265_v1 = vld [vmem:[%s2511_s0 + $0x8] sm:$0xff] }
  0x1a   : > { %267 = vst.msk [vmem:[#allocation2] sm:$0xff] %vm266_vm0, %v264_v0  ;;  %268 = vst.msk [vmem:[#allocation2 + $0x8] sm:$0xff] %vm266_vm0, %v265_v1 }
  0x1b PF: > { %v2241_v2 = vld [vmem:[%s2221_s12 + $0x30] sm:$0xff]  ;;  %v2244_v3 = vld [vmem:[%s2221_s12 + $0x20] sm:$0xff]  ;;  %vm294_vm1 = vcmask 261120   ;;  %v290_v8 = vlaneseq  ;;  %s2117_s6 = smov 88   ;;  %s2118_s8 = smov 96   ;;  %vm394_vm2 = vcmask 64512  }
  0x1c   : > { %1843 = vmatprep.subr.mxu1 %v2241_v2  ;;  %v2251_v5 = vld [vmem:[%s2221_s12 + $0x10] sm:$0xff]  ;;  %v2258_v6 = vld [vmem:[%s2221_s12] sm:$0xff]  ;;  %s2119_s9 = smov 120   ;;  %v2309_v25 = vld [vmem:[%s2512_s1 + $0x8] sm:$0xff]  ;;  %vm480_vm3 = vcmask 130048   ;;  %s2121_s26 = smov 56  }
  0x1d   : > { %1844 = vmatpush3.msra.mxu1 %v2241_v2  ;;  %v2268_v9 = vshrl.u32 %v290_v8, 7  ;;  %v2271_v11 = vld [vmem:[%s259_s23] sm:$0x1f]  ;;  %s2120_s23 = smov 64   ;;  %s2122_s7 = smov 80   ;;  %vm1220_vm4 = vcmask 195584  }
  0x1e   : > { %1845 = vmatprep.subr.mxu1 %v2244_v3  ;;  %v2314_v27 = vld [vmem:[%s2512_s1] sm:$0xff]  ;;  %s2123_s10 = smov 112   ;;  %s2124_s11 = smov 48   ;;  %vm1507_vm7 = vcmask 523264  }
  0x1f   : > { %1846 = vmatpush3.msra.mxu1 %v2244_v3  ;;  %v292_v10 = vsub.s32 0, %v2268_v9  ;;  %v380_v38 = vsub.s32 4, %v2268_v9  ;;  %s2127_s13 = smov 40   ;;  %s2128_s14 = smov 32  }
  0x20   : > { %1847 = vmatprep.subr.mxu1 %v2251_v5  ;;  %s2129_s16 = smov 8   ;;  %s2130_s17 = smov 16  }
  0x21   : > { %v2247_v4 = vld [vmem:[#allocation2] sm:$0xff]  ;;  %1848 = vmatpush3.msra.mxu1 %v2251_v5  ;;  %v2262_v7 = vld [vmem:[#allocation2 + $0x8] sm:$0xff]  ;;  %v293_v12 = vrot.slane %v2271_v11, %v292_v10  ;;  %v381_v40 = vrot.slane %v2271_v11, %v380_v38 }
  0x22   : > { %1851 = vmatprep.mubr.msk.f32.mxu1 %vm294_vm1, %v2247_v4  ;;  %1849 = vmatprep.subr.mxu1 %v2258_v6 }
  0x23   : > { %1850 = vmatpush3.msra.mxu1 %v2258_v6 }
  0x24   : > { %1852 = vmatmul.mubr.msk.f32.vlgmr.msra.gmra.mxu1 %vm294_vm1, %v2262_v7 }
  0xe4   : > { %v1853_v13 = vpop.f32.mrf.mxu1 }
  0xe5   : > { %v2274_v14 = vadd.f32 %v1853_v13, %v293_v12 }
  0xe6   : > { %v367_v15 = vpop.f32.mrf.mxu1 }
  0xe7   : > { %v2276_v16 = vadd.f32 %v367_v15, %v293_v12  ;;  %598 = vrot.lane.b32.xlu1 %v2274_v14, %s2117_s6  ;;  %392 = vrot.lane.b32.xlu0 %v2274_v14, %s2118_s8  ;;  %v2290_v18 = vmul.f32 0.35355338, %v2274_v14 }
  0xe9   : > { %v2282_v17 = vmul.f32 0.35355338, %v2276_v16 }
  0xeb   : > { %596 = vrot.lane.b32.xlu1 %v2276_v16, %s2117_s6  ;;  %390 = vrot.lane.b32.xlu0 %v2276_v16, %s2118_s8  ;;  %s2125_s6 = smov 72  }
  0xec   : > { %1858 = vmatprep.mubr.msk.f32.mxu1 %vm394_vm2, %v2282_v17 }
  0xef   : > { %594 = vrot.lane.b32.xlu1 %v2290_v18, %s2119_s9  ;;  %592 = vrot.lane.b32.xlu0 %v2282_v17, %s2119_s9  ;;  %s2126_s9 = smov 104  }
 0x159   : > { %v393_v19 = vpop.permute.xlu0 %392  ;;  %v599_v20 = vpop.permute.xlu1 %598 }
 0x15a   : > { %1854 = vmatprep.subr.msk.mxu1 %vm394_vm2, %v393_v19 }
 0x15b   : > { %1855 = vmatpush3.xpose.msk.msra.mxu1 %vm394_vm2, %v393_v19 }
 0x15d   : > { %v391_v21 = vpop.permute.xlu0 %390  ;;  %v597_v23 = vpop.permute.xlu1 %596 }
 0x15e   : > { %1856 = vmatprep.subr.msk.mxu1 %vm394_vm2, %v391_v21 }
 0x15f   : > { %1857 = vmatpush3.xpose.msk.msra.mxu1 %vm394_vm2, %v391_v21 }
 0x160   : > { %1868 = vmatprep.subr.msk.mxu1 %vm394_vm2, %v599_v20 }
 0x161   : > { %v593_v22 = vpop.permute.xlu0 %592  ;;  %v595_v24 = vpop.permute.xlu1 %594 }
 0x162   : > { %1859 = vmatmul.mubr.msk.f32.vlgmr.msra.gmra.mxu1 %vm394_vm2, %v2290_v18 }
 0x163   : > { %1869 = vmatpush3.xpose.msk.msra.mxu1 %vm394_vm2, %v599_v20  ;;  %1872 = vmatprep.mubr.msk.f32.mxu1 %vm394_vm2, %v593_v22 }
 0x164   : > { %1870 = vmatprep.subr.msk.mxu1 %vm394_vm2, %v597_v23 }
 0x167   : > { %1871 = vmatpush3.xpose.msk.msra.mxu1 %vm394_vm2, %v597_v23 }
 0x16a   : > { %1873 = vmatmul.mubr.msk.f32.vlgmr.msra.gmra.mxu1 %vm394_vm2, %v595_v24 }
 0x222   : > { %v1860_v26 = vpop.f32.mrf.mxu1 }
 0x223   : > { %v477_v28 = vadd.f32 %v1860_v26, %v2309_v25 }
 0x224   : > { %v471_v29 = vpop.f32.mrf.mxu1 }
 0x225   : > { %v472_v30 = vadd.f32 %v471_v29, %v2314_v27  ;;  %v484_v31 = vsel %vm480_vm3, %v477_v28, -inf }
 0x226   : > { %485 = vmax.xlane.f32.xlu1 %v484_v31 }
 0x227   : > { %v481_v32 = vsel %vm480_vm3, %v472_v30, -inf }
 0x228   : > { %482 = vmax.xlane.f32.xlu0 %v481_v32 }
 0x22a   : > { %v1874_v33 = vpop.f32.mrf.mxu1 }
 0x22b   : > { %v680_v36 = vadd.f32 %v1874_v33, %v2309_v25 }
 0x22c   : > { %v674_v34 = vpop.f32.mrf.mxu1 }
 0x22d   : > { %v675_v35 = vadd.f32 %v674_v34, %v2314_v27  ;;  %v686_v39 = vsel %vm480_vm3, %v680_v36, -inf }
 0x22f   : > { %v683_v37 = vsel %vm480_vm3, %v675_v35, -inf }
 0x230   : > { %684 = vmax.xlane.f32.xlu0 %v683_v37 }
 0x234   : > { %687 = vmax.xlane.f32.xlu0 %v686_v39 }
 0x237   : > { %383 = vrot.lane.b32.xlu1 %v381_v40, %s2120_s23 }
 0x2af   : > { %v486_v41 = vpop.xlane.xlu1 %485 }
 0x2b0   : > { %v488_v42 = vsub.f32 %v477_v28, %v486_v41 }
 0x2b1   : > { %v483_v43 = vpop.xlane.xlu0 %482 }
 0x2b2   : > { %v491_v44 = vmul.f32 1.442695, %v488_v42  ;;  %v487_v45 = vsub.f32 %v472_v30, %v483_v43 }
 0x2b3   : > { %v384_v46 = vpop.permute.xlu1 %383 }
 0x2b4   : > { %2007 = vpow2.f32 %v491_v44  ;;  %v489_v47 = vmul.f32 1.442695, %v487_v45  ;;  %v2328_v48 = vmul.f32 %v384_v46, %v2274_v14  ;;  %v2334_v50 = vmul.f32 %v384_v46, %v2276_v16 }
 0x2b6   : > { %2009 = vpow2.f32 %v489_v47  ;;  %507 = vrot.lane.b32.xlu1 %v2328_v48, %s2120_s23 }
 0x2b9   : > { %v685_v49 = vpop.xlane.xlu0 %684 }
 0x2ba   : > { %707 = vrot.lane.b32.xlu1 %v2328_v48, %s2121_s26  ;;  %v689_v51 = vsub.f32 %v675_v35, %v685_v49 }
 0x2bc   : > { %v691_v54 = vmul.f32 1.442695, %v689_v51 }
 0x2bd   : > { %v688_v52 = vpop.xlane.xlu0 %687 }
 0x2be   : > { %v690_v53 = vsub.f32 %v680_v36, %v688_v52  ;;  %705 = vrot.lane.b32.xlu1 %v2334_v50, %s2121_s26  ;;  %s2131_s26 = smov 24  }
 0x2c0   : > { %v693_v55 = vmul.f32 1.442695, %v690_v53 }
 0x2c1   : > { %v2008_v56 = vpop.eup %2007 }
 0x2c2   : > { %2011 = vpow2.f32 %v693_v55  ;;  %798 = vrot.lane.b32.xlu1 %v2274_v14, %s2122_s7  ;;  %v496_v57 = vsel %vm480_vm3, %v2008_v56, 0.0 }
 0x2c3   : > { %v2010_v58 = vpop.eup %2009  ;;  %497 = vadd.xlane.f32.xlu0 %v496_v57  ;;  %2013 = vpow2.f32 %v691_v54 }
 0x2c4   : > { %v493_v59 = vsel %vm480_vm3, %v2010_v58, 0.0 }
 0x2c6   : > { %796 = vrot.lane.b32.xlu1 %v2276_v16, %s2122_s7 }
 0x2c7   : > { %494 = vadd.xlane.f32.xlu0 %v493_v59 }
 0x2ca   : > { %792 = vrot.lane.b32.xlu1 %v2282_v17, %s2123_s10 }
 0x2cf   : > { %v2012_v60 = vpop.eup %2011 }
 0x2d0   : > { %v698_v61 = vsel %vm480_vm3, %v2012_v60, 0.0  ;;  %v2014_v62 = vpop.eup %2013 }
 0x2d1   : > { %699 = vadd.xlane.f32.xlu0 %v698_v61  ;;  %v695_v63 = vsel %vm480_vm3, %v2014_v62, 0.0 }
 0x2d5   : > { %696 = vadd.xlane.f32.xlu0 %v695_v63 }
 0x2eb   : > { %505 = vrot.lane.b32.xlu0 %v2334_v50, %s2120_s23 }
 0x2ef   : > { %794 = vrot.lane.b32.xlu0 %v2290_v18, %s2123_s10 }
 0x328   : > { %v508_v0 = vpop.permute.xlu1 %507 }
 0x329   : > { %1861 = vmatprep.subr.mxu0 %v508_v0 }
 0x32a   : > { %1862 = vmatpush3.msra.mxu0 %v508_v0 }
 0x32c   : > { %v708_v10 = vpop.permute.xlu1 %707 }
 0x330   : > { %v706_v15 = vpop.permute.xlu1 %705 }
 0x334   : > { %v799_v24 = vpop.permute.xlu1 %798 }
 0x338   : > { %v797_v26 = vpop.permute.xlu1 %796 }
 0x33c   : > { %v793_v32 = vpop.permute.xlu1 %792 }
 0x34c   : > { %v498_v1 = vpop.xlane.xlu0 %497 }
 0x350   : > { %v495_v8 = vpop.xlane.xlu0 %494 }
 0x351   : > { %2015 = vrcp.f32 %v495_v8 }
 0x352   : > { %2017 = vrcp.f32 %v498_v1 }
 0x35a   : > { %v700_v12 = vpop.xlane.xlu0 %699 }
 0x35b   : > { %2019 = vrcp.f32 %v700_v12 }
 0x35e   : > { %v2016_v13 = vpop.eup %2015  ;;  %v697_v19 = vpop.xlane.xlu0 %696 }
 0x35f   : > { %2021 = vrcp.f32 %v697_v19  ;;  %v501_v20 = vmul.f32 %v2016_v13, %v2010_v58  ;;  %v2018_v21 = vpop.eup %2017 }
 0x360   : > { %v502_v23 = vmul.f32 %v2018_v21, %v2008_v56 }
 0x361   : > { %1865 = vmatprep.mubr.msk.f32.mxu0 %vm480_vm3, %v501_v20 }
 0x362   : > { %v506_v22 = vpop.permute.xlu0 %505 }
 0x363   : > { %1863 = vmatprep.subr.mxu0 %v506_v22 }
 0x364   : > { %1864 = vmatpush3.msra.mxu0 %v506_v22 }
 0x365   : > { %1866 = vmatmul.mubr.msk.f32.vlgmr.msra.gmra.mxu0 %vm480_vm3, %v502_v23  ;;  %1875 = vmatprep.subr.mxu0 %v708_v10 }
 0x366   : > { %1876 = vmatpush3.msra.mxu0 %v708_v10  ;;  %v795_v33 = vpop.permute.xlu0 %794 }
 0x367   : > { %1877 = vmatprep.subr.mxu0 %v706_v15 }
 0x368   : > { %1878 = vmatpush3.msra.mxu0 %v706_v15  ;;  %v2020_v28 = vpop.eup %2019 }
 0x369   : > { %1882 = vmatprep.subr.msk.mxu0 %vm394_vm2, %v799_v24  ;;  %v704_v31 = vmul.f32 %v2020_v28, %v2012_v60 }
 0x36c   : > { %v2022_v29 = vpop.eup %2021 }
 0x36d   : > { %v703_v30 = vmul.f32 %v2022_v29, %v2014_v62 }
 0x36f   : > { %1879 = vmatprep.mubr.msk.f32.mxu0 %vm480_vm3, %v703_v30 }
 0x370   : > { %1880 = vmatmul.mubr.msk.f32.vlgmr.msra.gmra.mxu0 %vm480_vm3, %v704_v31 }
 0x371   : > { %1883 = vmatpush3.xpose.msk.msra.mxu0 %vm394_vm2, %v799_v24  ;;  %1886 = vmatprep.mubr.msk.f32.mxu0 %vm394_vm2, %v793_v32 }
 0x372   : > { %1884 = vmatprep.subr.msk.mxu0 %vm394_vm2, %v797_v26 }
 0x375   : > { %1885 = vmatpush3.xpose.msk.msra.mxu0 %vm394_vm2, %v797_v26 }
 0x378   : > { %1887 = vmatmul.mubr.msk.f32.vlgmr.msra.gmra.mxu0 %vm394_vm2, %v795_v33 }
 0x425   : > { %v2357_v34 = vpop.f32.mrf.mxu0 }
 0x427   : > { %v2359_v35 = vpop.f32.mrf.mxu0 }
 0x430   : > { %v2361_v36 = vpop.f32.mrf.mxu0 }
 0x432   : > { %v2363_v37 = vpop.f32.mrf.mxu0 }
 0x438   : > { %v1888_v38 = vpop.f32.mrf.mxu0 }
 0x439   : > { %v880_v39 = vadd.f32 %v1888_v38, %v2309_v25 }
 0x43a   : > { %v874_v40 = vpop.f32.mrf.mxu0 }
 0x43b   : > { %v875_v41 = vadd.f32 %v874_v40, %v2314_v27  ;;  %v886_v42 = vsel %vm480_vm3, %v880_v39, -inf }
 0x43c   : > { %887 = vmax.xlane.f32.xlu0 %v886_v42 }
 0x43d   : > { %v883_v43 = vsel %vm480_vm3, %v875_v41, -inf }
 0x43e   : > { %884 = vmax.xlane.f32.xlu1 %v883_v43 }
 0x4c5   : > { %v888_v44 = vpop.xlane.xlu0 %887 }
 0x4c6   : > { %v890_v45 = vsub.f32 %v880_v39, %v888_v44 }
 0x4c7   : > { %v885_v46 = vpop.xlane.xlu1 %884 }
 0x4c8   : > { %v893_v47 = vmul.f32 1.442695, %v890_v45  ;;  %v889_v49 = vsub.f32 %v875_v41, %v885_v46 }
 0x4ca   : > { %2023 = vpow2.f32 %v893_v47  ;;  %v891_v51 = vmul.f32 1.442695, %v889_v49 }
 0x4cc   : > { %2025 = vpow2.f32 %v891_v51 }
 0x4d7   : > { %v2024_v52 = vpop.eup %2023 }
 0x4d8   : > { %v898_v53 = vsel %vm480_vm3, %v2024_v52, 0.0 }
 0x4d9   : > { %v2026_v54 = vpop.eup %2025  ;;  %899 = vadd.xlane.f32.xlu1 %v898_v53 }
 0x4da   : > { %v895_v55 = vsel %vm480_vm3, %v2026_v54, 0.0 }
 0x4db   : > { %896 = vadd.xlane.f32.xlu0 %v895_v55 }
 0x4ea   : > { %905 = vrot.lane.b32.xlu1 %v2334_v50, %s2124_s11 }
 0x4ee   : > { %998 = vrot.lane.b32.xlu1 %v2274_v14, %s2125_s6 }
 0x4f1   : > { %907 = vrot.lane.b32.xlu0 %v2328_v48, %s2124_s11  ;;  %s2133_s11 = smov [#allocation3]  }
 0x4f2   : > { %992 = vrot.lane.b32.xlu1 %v2282_v17, %s2126_s9 }
 0x4f5   : > { %996 = vrot.lane.b32.xlu0 %v2276_v16, %s2125_s6  ;;  %s2059_s6 = sshll.u32 %s2133_s11, 4  ;;  %s2060_s6 = int_to_ptr.vmem [resolvable:$false] %s2059_s6 }
 0x4f9   : > { %994 = vrot.lane.b32.xlu0 %v2290_v18, %s2126_s9  ;;  %s2061_s9 = scalar_lea.vmem %s2060_s6, 512 }
 0x562   : > { %v900_v56 = vpop.xlane.xlu1 %899 }
 0x563   : > { %2027 = vrcp.f32 %v900_v56 }
 0x564   : > { %v897_v57 = vpop.xlane.xlu0 %896 }
 0x565   : > { %2029 = vrcp.f32 %v897_v57 }
 0x566   : > { %v906_v58 = vpop.permute.xlu1 %905 }
 0x568   : > { %v908_v59 = vpop.permute.xlu0 %907 }
 0x569   : > { %1889 = vmatprep.subr.mxu1 %v908_v59 }
 0x56a   : > { %1890 = vmatpush3.msra.mxu1 %v908_v59  ;;  %v999_v60 = vpop.permute.xlu1 %998 }
 0x56b   : > { %1891 = vmatprep.subr.mxu1 %v906_v58 }
 0x56c   : > { %1892 = vmatpush3.msra.mxu1 %v906_v58  ;;  %v997_v18 = vpop.permute.xlu0 %996 }
 0x56d   : > { %1896 = vmatprep.subr.msk.mxu1 %vm394_vm2, %v999_v60 }
 0x56e   : > { %v993_v16 = vpop.permute.xlu1 %992 }
 0x570   : > { %v2028_v14 = vpop.eup %2027  ;;  %v995_v63 = vpop.permute.xlu0 %994 }
 0x571   : > { %v904_v62 = vmul.f32 %v2028_v14, %v2024_v52 }
 0x572   : > { %v2030_v61 = vpop.eup %2029 }
 0x573   : > { %v903_v17 = vmul.f32 %v2030_v61, %v2026_v54  ;;  %v1225_v54 = vsub.s32 1, %v2268_v9 }
 0x575   : > { %1893 = vmatprep.mubr.msk.f32.mxu1 %vm480_vm3, %v903_v17  ;;  %v1226_v55 = vrot.slane %v2271_v11, %v1225_v54 }
 0x576   : > { %1894 = vmatmul.mubr.msk.f32.vlgmr.msra.gmra.mxu1 %vm480_vm3, %v904_v62 }
 0x577   : > { %1897 = vmatpush3.xpose.msk.msra.mxu1 %vm394_vm2, %v999_v60  ;;  %1900 = vmatprep.mubr.msk.f32.mxu1 %vm394_vm2, %v993_v16 }
 0x578   : > { %1898 = vmatprep.subr.msk.mxu1 %vm394_vm2, %v997_v18 }
 0x57b   : > { %1899 = vmatpush3.xpose.msk.msra.mxu1 %vm394_vm2, %v997_v18 }
 0x57e   : > { %1901 = vmatmul.mubr.msk.f32.vlgmr.msra.gmra.mxu1 %vm394_vm2, %v995_v63 }
 0x636   : > { %v1895_v0 = vpop.f32.mrf.mxu1 }
 0x638   : > { %v983_v1 = vpop.f32.mrf.mxu1 }
 0x63e   : > { %v1902_v8 = vpop.f32.mrf.mxu1 }
 0x63f   : > { %v1080_v10 = vadd.f32 %v1902_v8, %v2309_v25  ;;  %v280_v8 = vld [vmem:[%s2221_s12 + $0x38] sm:$0xff] }
 0x640   : > { %v1074_v12 = vpop.f32.mrf.mxu1  ;;  %1921 = vmatprep.subr.mxu1 %v280_v8 }
 0x641   : > { %v1075_v13 = vadd.f32 %v1074_v12, %v2314_v27  ;;  %v1086_v15 = vsel %vm480_vm3, %v1080_v10, -inf  ;;  %1922 = vmatpush3.msra.mxu1 %v280_v8  ;;  %v276_v12 = vld [vmem:[%s2221_s12 + $0x18] sm:$0xff] }
 0x642   : > { %1087 = vmax.xlane.f32.xlu0 %v1086_v15 }
 0x643   : > { %v1083_v19 = vsel %vm480_vm3, %v1075_v13, -inf }
 0x644   : > { %1084 = vmax.xlane.f32.xlu1 %v1083_v19 }
 0x6cb   : > { %v1088_v20 = vpop.xlane.xlu0 %1087 }
 0x6cc   : > { %v1090_v21 = vsub.f32 %v1080_v10, %v1088_v20  ;;  %v278_v10 = vld [vmem:[%s2221_s12 + $0x28] sm:$0xff] }
 0x6cd   : > { %v1085_v22 = vpop.xlane.xlu1 %1084  ;;  %1923 = vmatprep.subr.mxu1 %v278_v10 }
 0x6ce   : > { %v1093_v23 = vmul.f32 1.442695, %v1090_v21  ;;  %v1089_v24 = vsub.f32 %v1075_v13, %v1085_v22  ;;  %1924 = vmatpush3.msra.mxu1 %v278_v10  ;;  %v274_v13 = vld [vmem:[%s2221_s12 + $0x8] sm:$0xff]  ;;  %s1782_s12 = sshll.u32 %s2186_s22, 8  ;;  %s2470_s22 = scalar_lea.sflag [#allocation4], %s243_s30 }
 0x6cf   : > { %1925 = vmatprep.subr.mxu1 %v276_v12  ;;  %s2458_s7 = scalar_lea.hbm %s2516_s5, %s1782_s12 }
 0x6d0   : > { %2031 = vpow2.f32 %v1093_v23  ;;  %v1091_v26 = vmul.f32 1.442695, %v1089_v24  ;;  %1926 = vmatpush3.msra.mxu1 %v276_v12 }
 0x6d1   : > { %1927 = vmatprep.subr.mxu1 %v274_v13 }
 0x6d2   : > { %2033 = vpow2.f32 %v1091_v26  ;;  %1928 = vmatpush3.msra.mxu1 %v274_v13 }
 0x6dd   : > { %v2032_v28 = vpop.eup %2031 }
 0x6de   : > { %v1098_v25 = vsel %vm480_vm3, %v2032_v28, 0.0 }
 0x6df   : > { %v2034_v29 = vpop.eup %2033  ;;  %1099 = vadd.xlane.f32.xlu1 %v1098_v25 }
 0x6e0   : > { %v1095_v27 = vsel %vm480_vm3, %v2034_v29, 0.0 }
 0x6e1   : > { %1096 = vadd.xlane.f32.xlu0 %v1095_v27 }
 0x6f0   : > { %1105 = vrot.lane.b32.xlu1 %v2334_v50, %s2127_s13 }
 0x6f4   : > { %1237 = vrot.lane.b32.xlu1 %v2241_v2, %s2128_s14 }
 0x6f7   : > { %1107 = vrot.lane.b32.xlu0 %v2328_v48, %s2127_s13 }
 0x6f8   : > { %1194 = vrot.lane.b32.xlu1 %v2363_v37, %s2129_s16 }
 0x6fb   : > { %1235 = vrot.lane.b32.xlu0 %v2244_v3, %s2128_s14 }
 0x6fc   : > { %1196 = vrot.lane.b32.xlu1 %v2361_v36, %s2129_s16 }
 0x6ff   : > { %1233 = vrot.lane.b32.xlu0 %v2251_v5, %s2128_s14 }
 0x700   : > { %1204 = vrot.lane.b32.xlu1 %v1895_v0, %s2130_s17 }
 0x703   : > { %1202 = vrot.lane.b32.xlu0 %v983_v1, %s2130_s17 }
 0x704   : > { %1231 = vrot.lane.b32.xlu1 %v2258_v6, %s2128_s14 }
 0x768   : > { %v1100_v50 = vpop.xlane.xlu1 %1099 }
 0x769   : > { %2035 = vrcp.f32 %v1100_v50 }
 0x76a   : > { %v1097_v2 = vpop.xlane.xlu0 %1096 }
 0x76b   : > { %2037 = vrcp.f32 %v1097_v2 }
 0x76c   : > { %v1106_v48 = vpop.permute.xlu1 %1105 }
 0x76e   : > { %v1108_v30 = vpop.permute.xlu0 %1107 }
 0x76f   : > { %1903 = vmatprep.subr.mxu0 %v1108_v30 }
 0x770   : > { %1904 = vmatpush3.msra.mxu0 %v1108_v30  ;;  %v1238_v3 = vpop.permute.xlu1 %1237 }
 0x771   : > { %1905 = vmatprep.subr.mxu0 %v1106_v48 }
 0x772   : > { %1906 = vmatpush3.msra.mxu0 %v1106_v48  ;;  %v1236_v5 = vpop.permute.xlu0 %1235 }
 0x773   : > { %1910 = vmatprep.subr.mxu0 %v1238_v3 }
 0x774   : > { %v1195_v37 = vpop.permute.xlu1 %1194 }
 0x775   : > { %v1216_v44 = vsel %vm394_vm2, %v2359_v35, %v1195_v37  ;;  %v281_v37 = vld [vmem:[%s2226_s15] sm:$0xff] }
 0x776   : > { %v2036_v31 = vpop.eup %2035  ;;  %v1234_v6 = vpop.permute.xlu0 %1233 }
 0x777   : > { %v1104_v36 = vmul.f32 %v2036_v31, %v2032_v28  ;;  %v287_v31 = vld [vmem:[%s2226_s15 + $0x30] sm:$0xff] }
 0x778   : > { %v2038_v32 = vpop.eup %2037  ;;  %v1197_v38 = vpop.permute.xlu1 %1196 }
 0x779   : > { %v1103_v33 = vmul.f32 %v2038_v32, %v2034_v29  ;;  %v1217_v49 = vsel %vm394_vm2, %v2357_v34, %v1197_v38  ;;  %v286_v32 = vld [vmem:[%s2226_s15 + $0x28] sm:$0xff]  ;;  %v1366_v38 = vsub.s32 2, %v2268_v9 }
 0x77a   : > { %v1203_v43 = vpop.permute.xlu0 %1202 }
 0x77b   : > { %1907 = vmatprep.mubr.msk.f32.mxu0 %vm480_vm3, %v1103_v33  ;;  %v1218_v45 = vsel %vm480_vm3, %v1216_v44, %v1203_v43  ;;  %v284_v33 = vld [vmem:[%s2226_s15 + $0x18] sm:$0xff] }
 0x77c   : > { %1908 = vmatmul.mubr.msk.f32.vlgmr.msra.gmra.mxu0 %vm480_vm3, %v1104_v36  ;;  %v1205_v39 = vpop.permute.xlu1 %1204  ;;  %v283_v36 = vld [vmem:[%s2226_s15 + $0x10] sm:$0xff] }
 0x77d   : > { %1911 = vmatpush3.msra.mxu0 %v1238_v3  ;;  %v1219_v51 = vsel %vm480_vm3, %v1217_v49, %v1205_v39  ;;  %v288_v3 = vld [vmem:[%s2226_s15 + $0x38] sm:$0xff]  ;;  %v1367_v39 = vrot.slane %v2271_v11, %v1366_v38 }
 0x77e   : > { %1912 = vmatprep.subr.mxu0 %v1236_v5 }
 0x77f   : > { %1913 = vmatpush3.msra.mxu0 %v1236_v5  ;;  %v285_v5 = vld [vmem:[%s2226_s15 + $0x20] sm:$0xff] }
 0x780   : > { %1914 = vmatprep.subr.mxu0 %v1234_v6  ;;  %v1232_v40 = vpop.permute.xlu1 %1231 }
 0x781   : > { %1915 = vmatpush3.msra.mxu0 %v1234_v6  ;;  %v282_v6 = vld [vmem:[%s2226_s15 + $0x8] sm:$0xff]  ;;  %s1646_s15 = sshll.u32 %s2231_s25, 4  ;;  %s2463_s15 = int_to_ptr.vmem [resolvable:$true] %s1646_s15 }
 0x782   : > { %1916 = vmatprep.subr.mxu0 %v1232_v40  ;;  %s2055_s10 = scalar_lea.vmem %s2463_s15, 256  ;;  %p2062_p1 = scmp.lt.s32.totalorder %s2463_s15, %s2060_s6 }
 0x783   : > { %1917 = vmatpush3.msra.mxu0 %v1232_v40  ;;  %p2056_p12 = scmp.ne.s32.totalorder %s2463_s15, %s2055_s10  ;;  %p2063_p2 = scmp.lt.s32.totalorder %s2061_s9, %s2055_s10 }
 0x784   : > { %1932 = vmatprep.subr.mxu0 %v288_v3 }
 0x785   : > { %p2057_p13 = pnand %p2056_p12, %p2203_p5  ;;  %p2064_p3 = por %p2063_p2, %p2062_p1 }
 0x787   : > { %p2058_p0 = pneg %p2057_p13 }
 0x789   : > { %p2065_p4 = pnand %p2064_p3, %p2058_p0 }
 0x83c   : > { %v1909_v41 = vpop.f32.mrf.mxu0 }
 0x83e   : > { %v1183_v42 = vpop.f32.mrf.mxu0 }
 0x83f   : > { %1210 = vrot.lane.b32.xlu0 %v1183_v42, %s2131_s26 }
 0x843   : > { %1212 = vrot.lane.b32.xlu0 %v1909_v41, %s2131_s26 }
 0x8b1   : > { %v1211_v46 = vpop.permute.xlu0 %1210 }
 0x8b2   : > { %v1221_v47 = vsel %vm1220_vm4, %v1218_v45, %v1211_v46 }
 0x8b3   : > { %1918 = vmatprep.mubr.msk.f32.mxu0 %vm294_vm1, %v1221_v47 }
 0x8b5   : > { %v1213_v52 = vpop.permute.xlu0 %1212 }
 0x8b6   : > { %v1222_v53 = vsel %vm1220_vm4, %v1219_v51, %v1213_v52 }
 0x8b7   : > { %1919 = vmatmul.mubr.msk.f32.vlgmr.msra.gmra.mxu0 %vm294_vm1, %v1222_v53 }
 0x8b8   : > { %1933 = vmatpush3.msra.mxu0 %v288_v3 }
 0x8b9   : > { %1934 = vmatprep.subr.mxu0 %v287_v31 }
 0x8ba   : > { %1935 = vmatpush3.msra.mxu0 %v287_v31 }
 0x8bb   : > { %1936 = vmatprep.subr.mxu0 %v286_v32 }
 0x8bc   : > { %1937 = vmatpush3.msra.mxu0 %v286_v32 }
 0x8bd   : > { %1938 = vmatprep.subr.mxu0 %v285_v5 }
 0x8be   : > { %1939 = vmatpush3.msra.mxu0 %v285_v5 }
 0x8bf   : > { %1940 = vmatprep.subr.mxu0 %v284_v33 }
 0x8c0   : > { %1941 = vmatpush3.msra.mxu0 %v284_v33 }
 0x8c1   : > { %1942 = vmatprep.subr.mxu0 %v283_v36 }
 0x8c2   : > { %1943 = vmatpush3.msra.mxu0 %v283_v36  ;;  %v1505_v36 = vsub.s32 3, %v2268_v9 }
 0x8c3   : > { %1944 = vmatprep.subr.mxu0 %v282_v6 }
 0x8c4   : > { %1945 = vmatpush3.msra.mxu0 %v282_v6  ;;  %v1506_v6 = vrot.slane %v2271_v11, %v1505_v36 }
 0x8c5   : > { %1946 = vmatprep.subr.mxu0 %v281_v37 }
 0x8c6   : > { %1947 = vmatpush3.msra.mxu0 %v281_v37 }
 0x977   : > { %v1920_v35 = vpop.f32.mrf.mxu0 }
 0x978   : > { %v1321_v56 = vadd.f32 %v1920_v35, %v1226_v55 }
 0x979   : > { %v1315_v57 = vpop.f32.mrf.mxu0 }
 0x97a   : > { %v1316_v58 = vadd.f32 %v1315_v57, %v1226_v55  ;;  %v1325_v59 = vadd.f32 %v1321_v56, %v2262_v7 }
 0x97c   : > { %v1329_v60 = vsel %vm294_vm1, %v1325_v59, 0.0  ;;  %v1324_v34 = vadd.f32 %v1316_v58, %v2247_v4 }
 0x97d   : > { %1330 = vadd.xlane.f32.xlu0 %v1329_v60 }
 0x97e   : > { %v1326_v14 = vsel %vm294_vm1, %v1324_v34, 0.0 }
 0x97f   : > { %1327 = vadd.xlane.f32.xlu1 %v1326_v14 }
 0xa06   : > { %v1331_v61 = vpop.xlane.xlu0 %1330 }
 0xa07   : > { %v1334_v17 = vmul.f32 0.03125, %v1331_v61 }
 0xa08   : > { %v1328_v62 = vpop.xlane.xlu1 %1327 }
 0xa09   : > { %v1336_v16 = vsub.f32 %v1325_v59, %v1334_v17  ;;  %v1333_v18 = vmul.f32 0.03125, %v1328_v62 }
 0xa0b   : > { %v1335_v63 = vsub.f32 %v1324_v34, %v1333_v18  ;;  %v1338_v0 = vmul.f32 %v1336_v16, %v1336_v16 }
 0xa0d   : > { %v1342_v7 = vsel %vm294_vm1, %v1338_v0, 0.0  ;;  %v1337_v1 = vmul.f32 %v1335_v63, %v1335_v63 }
 0xa0e   : > { %1343 = vadd.xlane.f32.xlu1 %v1342_v7 }
 0xa0f   : > { %v1339_v4 = vsel %vm294_vm1, %v1337_v1, 0.0 }
 0xa10   : > { %1340 = vadd.xlane.f32.xlu0 %v1339_v4 }
 0xa1f   : > { %1359 = vrot.lane.b32.xlu1 %v1226_v55, %s2120_s23 }
 0xa26   : > { %1354 = vrot.lane.b32.xlu0 %v1226_v55, %s2118_s8 }
 0xa97   : > { %v1344_v15 = vpop.xlane.xlu1 %1343 }
 0xa98   : > { %v1346_v19 = vmul.f32 0.03125, %v1344_v15 }
 0xa99   : > { %v1341_v20 = vpop.xlane.xlu0 %1340 }
 0xa9a   : > { %v1348_v21 = vadd.f32 1e-05, %v1346_v19  ;;  %v1345_v22 = vmul.f32 0.03125, %v1341_v20 }
 0xa9b   : > { %v1360_v2 = vpop.permute.xlu1 %1359 }
 0xa9c   : > { %2039 = vrsqrt.f32 %v1348_v21  ;;  %v1347_v23 = vadd.f32 1e-05, %v1345_v22 }
 0xa9d   : > { %v1355_v26 = vpop.permute.xlu0 %1354 }
 0xa9e   : > { %2041 = vrsqrt.f32 %v1347_v23 }
 0xaa9   : > { %v2040_v24 = vpop.eup %2039 }
 0xaaa   : > { %v1352_v28 = vmul.f32 %v2040_v24, %v1336_v16  ;;  %v2132_v24 = vmov -1.0  }
 0xaab   : > { %v2042_v25 = vpop.eup %2041 }
 0xaac   : > { %v1351_v29 = vmul.f32 %v2042_v25, %v1335_v63  ;;  %v1358_v27 = vmul.f32 %v1355_v26, %v1352_v28 }
 0xaae   : > { %v1357_v50 = vmul.f32 %v1355_v26, %v1351_v29  ;;  %v2427_v30 = vadd.f32 %v1360_v2, %v1358_v27 }
 0xab0   : > { %v2425_v48 = vadd.f32 %v1360_v2, %v1357_v50 }
 0xab2   : > { %1929 = vmatprep.mubr.msk.f32.mxu1 %vm294_vm1, %v2425_v48 }
 0xab3   : > { %1930 = vmatmul.mubr.msk.f32.vlgmr.msra.gmra.mxu1 %vm294_vm1, %v2427_v30 }
 0xb73   : > { %v1931_v40 = vpop.f32.mrf.mxu1 }
 0xb74   : > { %v1446_v41 = vadd.f32 %v1931_v40, %v1367_v39 }
 0xb75   : > { %v1440_v42 = vpop.f32.mrf.mxu1 }
 0xb76   : > { %v1452_v43 = vmul.f32 0.70710677, %v1446_v41  ;;  %v1441_v44 = vadd.f32 %v1440_v42, %v1367_v39  ;;  %v1450_v32 = vmul.f32 0.5, %v1446_v41 }
 0xb78   : > { %v1458_v45 = vand.u32 2147483647, %v1452_v43  ;;  %v1451_v46 = vmul.f32 0.70710677, %v1441_v44  ;;  %vm1454_vm5 = vcmp.ge.f32.partialorder %v1452_v43, 0.0  ;;  %v1449_v3 = vmul.f32 0.5, %v1441_v44 }
 0xb79   : > { %v1456_v26 = vsel %vm1454_vm5, 1.0, %v2132_v24 }
 0xb7a   : > { %v1460_v47 = vmul.f32 0.3275911, %v1458_v45  ;;  %v1457_v49 = vand.u32 2147483647, %v1451_v46  ;;  %v1486_v54 = vsub.f32 0.0, %v1458_v45  ;;  %vm1453_vm6 = vcmp.ge.f32.partialorder %v1451_v46, 0.0 }
 0xb7b   : > { %v1455_v27 = vsel %vm1453_vm6, 1.0, %v2132_v24 }
 0xb7c   : > { %v1462_v51 = vadd.f32 1.0, %v1460_v47  ;;  %v1459_v52 = vmul.f32 0.3275911, %v1457_v49  ;;  %v1485_v55 = vsub.f32 0.0, %v1457_v49  ;;  %v1488_v35 = vmul.f32 %v1486_v54, %v1458_v45 }
 0xb7e   : > { %2043 = vrcp.f32 %v1462_v51  ;;  %v1461_v53 = vadd.f32 1.0, %v1459_v52  ;;  %v1487_v57 = vmul.f32 %v1485_v55, %v1457_v49  ;;  %v1491_v59 = vmul.f32 1.442695, %v1488_v35 }
 0xb80   : > { %2045 = vrcp.f32 %v1461_v53  ;;  %v1489_v61 = vmul.f32 1.442695, %v1487_v57 }
 0xb81   : > { %2047 = vpow2.f32 %v1491_v59 }
 0xb82   : > { %2049 = vpow2.f32 %v1489_v61 }
 0xb8b   : > { %v2044_v56 = vpop.eup %2043 }
 0xb8c   : > { %v1468_v58 = vmul.f32 1.0614054, %v2044_v56 }
 0xb8d   : > { %v2046_v60 = vpop.eup %2045 }
 0xb8e   : > { %v1470_v34 = vadd.f32 -1.4531521, %v1468_v58  ;;  %v1467_v14 = vmul.f32 1.0614054, %v2046_v60  ;;  %v2048_v15 = vpop.eup %2047 }
 0xb8f   : > { %v2050_v22 = vpop.eup %2049 }
 0xb90   : > { %v1472_v17 = vmul.f32 %v2044_v56, %v1470_v34  ;;  %v1469_v62 = vadd.f32 -1.4531521, %v1467_v14 }
 0xb92   : > { %v1474_v16 = vadd.f32 1.4214138, %v1472_v17  ;;  %v1471_v18 = vmul.f32 %v2046_v60, %v1469_v62 }
 0xb94   : > { %v1476_v63 = vmul.f32 %v2044_v56, %v1474_v16  ;;  %v1473_v0 = vadd.f32 1.4214138, %v1471_v18 }
 0xb96   : > { %v1478_v7 = vadd.f32 -0.28449672, %v1476_v63  ;;  %v1475_v1 = vmul.f32 %v2046_v60, %v1473_v0 }
 0xb98   : > { %v1480_v4 = vmul.f32 %v2044_v56, %v1478_v7  ;;  %v1477_v8 = vadd.f32 -0.28449672, %v1475_v1 }
 0xb9a   : > { %v1482_v10 = vadd.f32 0.2548296, %v1480_v4  ;;  %v1479_v12 = vmul.f32 %v2046_v60, %v1477_v8 }
 0xb9c   : > { %v1484_v13 = vmul.f32 %v2044_v56, %v1482_v10  ;;  %v1481_v19 = vadd.f32 0.2548296, %v1479_v12 }
 0xb9e   : > { %v1494_v20 = vmul.f32 %v2048_v15, %v1484_v13  ;;  %v1483_v21 = vmul.f32 %v2046_v60, %v1481_v19 }
 0xba0   : > { %v1496_v23 = vsub.f32 1.0, %v1494_v20  ;;  %v1493_v28 = vmul.f32 %v2050_v22, %v1483_v21 }
 0xba2   : > { %v1498_v25 = vmul.f32 %v1496_v23, %v1456_v26  ;;  %v1495_v29 = vsub.f32 1.0, %v1493_v28 }
 0xba4   : > { %v1497_v50 = vmul.f32 %v1495_v29, %v1455_v27  ;;  %v1500_v2 = vadd.f32 1.0, %v1498_v25 }
 0xba6   : > { %v1499_v31 = vadd.f32 1.0, %v1497_v50  ;;  %v1502_v33 = vmul.f32 %v1500_v2, %v1450_v32 }
 0xba8   : > { %v1501_v5 = vmul.f32 %v1499_v31, %v1449_v3 }
 0xbaa   : > { %1948 = vmatprep.mubr.msk.f32.mxu0 %vm1507_vm7, %v1501_v5 }
 0xbab   : > { %1949 = vmatmul.mubr.msk.f32.vlgmr.msra.gmra.mxu0 %vm1507_vm7, %v1502_v33 }
 0xc6b   : > { %v1950_v37 = vpop.f32.mrf.mxu0 }
 0xc6c   : > { %v1586_v38 = vadd.f32 %v1950_v37, %v1506_v6 }
 0xc6d   : > { %v1580_v39 = vpop.f32.mrf.mxu0 }
 0xc6e   : > { %v1581_v40 = vadd.f32 %v1580_v39, %v1506_v6  ;;  %v1590_v42 = vadd.f32 %v1586_v38, %v2427_v30 }
 0xc70   : > { %v1594_v43 = vsel %vm294_vm1, %v1590_v42, 0.0  ;;  %v1589_v44 = vadd.f32 %v1581_v40, %v2425_v48 }
 0xc71   : > { %1595 = vadd.xlane.f32.xlu0 %v1594_v43 }
 0xc72   : > { %v1591_v41 = vsel %vm294_vm1, %v1589_v44, 0.0 }
 0xc73   : > { %1592 = vadd.xlane.f32.xlu1 %v1591_v41 }
 0xcfa   : > { %v1596_v45 = vpop.xlane.xlu0 %1595 }
 0xcfb   : > { %v1598_v46 = vmul.f32 0.03125, %v1596_v45 }
 0xcfc   : > { %v1593_v47 = vpop.xlane.xlu1 %1592 }
 0xcfd   : > { %v1600_v9 = vsub.f32 %v1590_v42, %v1598_v46  ;;  %v1597_v49 = vmul.f32 0.03125, %v1593_v47 }
 0xcff   : > { %v1599_v11 = vsub.f32 %v1589_v44, %v1597_v49  ;;  %v1602_v51 = vmul.f32 %v1600_v9, %v1600_v9 }
 0xd01   : > { %v1606_v52 = vsel %vm294_vm1, %v1602_v51, 0.0  ;;  %v1601_v53 = vmul.f32 %v1599_v11, %v1599_v11 }
 0xd02   : > { %1607 = vadd.xlane.f32.xlu1 %v1606_v52 }
 0xd03   : > { %v1603_v30 = vsel %vm294_vm1, %v1601_v53, 0.0 }
 0xd04   : > { %1604 = vadd.xlane.f32.xlu0 %v1603_v30 }
 0xd13   : > { %1623 = vrot.lane.b32.xlu1 %v1506_v6, %s2120_s23 }
 0xd1a   : > { %1618 = vrot.lane.b32.xlu0 %v1506_v6, %s2118_s8 }
 0xd8b   : > { %v1608_v48 = vpop.xlane.xlu1 %1607 }
 0xd8c   : > { %v1610_v54 = vmul.f32 0.03125, %v1608_v48 }
 0xd8d   : > { %v1605_v55 = vpop.xlane.xlu0 %1604 }
 0xd8e   : > { %v1612_v35 = vadd.f32 1e-05, %v1610_v54  ;;  %v1609_v56 = vmul.f32 0.03125, %v1605_v55 }
 0xd8f   : > { %v1624_v14 = vpop.permute.xlu1 %1623 }
 0xd90   : > { %2051 = vrsqrt.f32 %v1612_v35  ;;  %v1611_v57 = vadd.f32 1e-05, %v1609_v56 }
 0xd91   : > { %v1619_v59 = vpop.permute.xlu0 %1618 }
 0xd92   : > { %2053 = vrsqrt.f32 %v1611_v57 }
 0xd9d   : > { %v2052_v58 = vpop.eup %2051 }
 0xd9e   : > { %v1616_v60 = vmul.f32 %v2052_v58, %v1600_v9 }
 0xd9f   : > { %v2054_v34 = vpop.eup %2053 }
 0xda0   : > { %v1615_v61 = vmul.f32 %v2054_v34, %v1599_v11  ;;  %v1622_v17 = vmul.f32 %v1619_v59, %v1616_v60 }
 0xda2   : > { %v1621_v62 = vmul.f32 %v1619_v59, %v1615_v61  ;;  %v1627_v16 = vadd.f32 %v1624_v14, %v1622_v17 }
 0xda4   : > { %v1626_v18 = vadd.f32 %v1624_v14, %v1621_v62  ;;  %1629 = vst.msk [vmem:[#allocation2 + $0x8] sm:$0xff] %vm294_vm1, %v1627_v16  ;;  %1631 = vst.msk [vmem:[%s2231_s25 + $0x8] sm:$0xff] %vm294_vm1, %v1627_v16 }
 0xda6   : > { %1628 = vst.msk [vmem:[#allocation2] sm:$0xff] %vm294_vm1, %v1626_v18  ;;  %1630 = vst.msk [vmem:[%s2231_s25] sm:$0xff] %vm294_vm1, %v1626_v18 }
 0xda7   : > { %2068 = shalt.err (!%p2065_p4)
}
 0xda8   : > { %s2069_s30 = scalar_lea.hbm %s2458_s7, 256  ;;  %s2073_s14 = scalar_lea.hbm %s2516_s5, 512 }
 0xda9   : > { %p2070_p7 = scmp.ne.s32.totalorder %s2458_s7, %s2069_s30  ;;  %p2074_p10 = scmp.lt.s32.totalorder %s2458_s7, %s2516_s5 }
 0xdaa   : > { %p2075_p11 = scmp.lt.s32.totalorder %s2073_s14, %s2069_s30 }
 0xdab   : > { %p2071_p8 = pnand %p2070_p7, %p2203_p5 }
 0xdac   : > { %p2076_p12 = por %p2075_p11, %p2074_p10 }
 0xdad   : > { %p2072_p9 = pneg %p2071_p8 }
 0xdaf   : > { %p2077_p13 = pnand %p2076_p12, %p2072_p9 }
 0xdb1   : > { %2080 = shalt.err (!%p2077_p13)
}
 0xdb2   : > { %s2134_s12 = smov 128  }
 0xdb3   : > { %1951 = dma.vmem_to_hbm [thread:$0]  (%p2203_p5), %s2463_s15, 256, %s2458_s7, %s2470_s22, %s2134_s12, %s2134_s12, %s2129_s16  }
 0xdb4 PF: > { %p1957_p0 = scmp.ge.s32.totalorder %s2115_s21, 2  ;;  %s1661_s8 = sand.u32 1, %s2103_s18  }
 0xdb5   : > { %s1662_s23 = scalar_lea.sflag [#allocation4], %s1661_s8 }
 0xdb6   : > { %p1954_p1 = pnand %p1957_p0, %p2207_p6 }
 0xdb8   : > { %p1955_p2 = pneg %p1954_p1 }
 0xdba   : > { %2098 = dma.done.wait (%p1955_p2), %s1662_s23, 256  }
 0xdbb   : > { %2100 = vsyncadd (%p1955_p2), %s1662_s23, 4294967040  ;;  %p15_p3 = scmp.ge.s32.totalorder %s2190_s24, 4   ;;  %s2519_s18 = smov %s2107_s19 }
 0xdbc   : > { %s2520_s19 = smov %s2111_s20  ;;  %s2521_s20 = smov %s2201_s27 }
 0xdbd   : > { %s2522_s21 = smov %s2190_s24  ;;  %17 = sbr.rel (!%p15_p3) target bundleno = 3 (0x3), region = 85 }
 0xdc2   :  { %1667 = vsyncpa [#allocation4], 1 }
 0xdc3   :  { %1669 = vsyncpa [#allocation4 + $0x1], 1 }

</bundles_post_ra>
